<compile_context>
chip_gen: v7x
topology: tpu7x:2x2x1
jax: 0.10.0
libtpu: 0.0.40
codegen_flags: <defaults>
</compile_context>

<pallas_src>
import jax
import jax.numpy as jnp
from jax.experimental import pallas as pl
from jax.experimental.pallas import tpu as pltpu


def _round_up(n: int, m: int) -> int:
    return ((n + m - 1) // m) * m


def _vmem_capacity_bytes() -> int:
    try:
        return int(pltpu.get_tpu_info().vmem_capacity_bytes)
    except Exception:
        return 64 << 20  # conservative default (v7x per-TensorCore VMEM)


def _const_spec(shape, index_map, single_buffer):
    """BlockSpec for a grid-invariant (VMEM-resident) operand."""
    if single_buffer:
        return pl.BlockSpec(shape, index_map, pipeline_mode=pl.Buffered(1))
    return pl.BlockSpec(shape, index_map)


# ---------------------------------------------------------------------------
# Kernels
# ---------------------------------------------------------------------------
def _resident_kernel(x_ref, w1_ref, b1_ref, w2_ref, b2_ref, out_ref):
    # Backbone Linear: bf16 operands (x cast in-kernel), f32 MXU accumulation.
    x = x_ref[...].astype(jnp.bfloat16)
    h = jnp.dot(x, w1_ref[...], preferred_element_type=jnp.float32)
    h = jnp.maximum(h + b1_ref[...], 0.0)                       # f32 epilogue
    # Classifier Linear: bf16 x bf16 MXU, f32 accumulation.
    logits = jnp.dot(h.astype(jnp.bfloat16), w2_ref[...],
                     preferred_element_type=jnp.float32)
    out_ref[...] = (logits + b2_ref[...]).astype(out_ref.dtype)


def _ksplit_kernel(x_ref, w1_ref, b1_ref, w2_ref, b2_ref, out_ref, acc_ref):
    # Streams w1 along K; f32 accumulator persists across the K axis.
    k = pl.program_id(1)

    @pl.when(k == 0)
    def _():
        acc_ref[...] = jnp.zeros_like(acc_ref)

    acc_ref[...] += jnp.dot(x_ref[...].astype(jnp.bfloat16), w1_ref[...],
                            preferred_element_type=jnp.float32)

    @pl.when(k == pl.num_programs(1) - 1)
    def _():
        h = jnp.maximum(acc_ref[...] + b1_ref[...], 0.0)
        logits = jnp.dot(h.astype(jnp.bfloat16), w2_ref[...],
                         preferred_element_type=jnp.float32)
        out_ref[...] = (logits + b2_ref[...]).astype(out_ref.dtype)


# ---------------------------------------------------------------------------
# One-time parameter preparation (hoisted out of the per-call forward)
# ---------------------------------------------------------------------------
def prepare_params(w1, b1, w2, b2, *, k_tile=512, force_k_split=False):
    """Pad lane dims to 128, cast weights to bf16 storage, and decide whether
    w1 stays fully VMEM-resident or must be K-tiled (streamed)."""
    in_dim, rep_dim = w1.shape
    num_classes = w2.shape[1]
    R = _round_up(rep_dim, 128)
    C = _round_up(num_classes, 128)

    # Resident-w1 budget: leave room for streamed x/out tiles, w2, scratch.
    w1_bytes = in_dim * R * 2
    budget = int(0.4 * _vmem_capacity_bytes())
    k_split = bool(force_k_split) or (w1_bytes > budget)

    k_tile = max(128, _round_up(int(k_tile), 128))
    Kp = _round_up(in_dim, k_tile) if k_split else in_dim

    w1_p = jnp.zeros((Kp, R), jnp.bfloat16).at[:in_dim, :rep_dim].set(
        w1.astype(jnp.bfloat16))
    b1_p = jnp.zeros((1, R), jnp.float32).at[0, :rep_dim].set(
        b1.astype(jnp.float32))
    w2_p = jnp.zeros((R, C), jnp.bfloat16).at[:rep_dim, :num_classes].set(
        w2.astype(jnp.bfloat16))
    b2_p = jnp.zeros((1, C), jnp.float32).at[0, :num_classes].set(
        b2.astype(jnp.float32))

    return dict(mode="ksplit" if k_split else "resident",
                in_dim=in_dim, rep_dim=rep_dim, num_classes=num_classes,
                R=R, C=C, Kp=Kp, k_tile=k_tile,
                w1=w1_p, b1=b1_p, w2=w2_p, b2=b2_p)


# ---------------------------------------------------------------------------
# Forward
# ---------------------------------------------------------------------------
def spuco_model_forward(x, params, *, batch_tile=256):
    """SpuCoModel forward: classifier(backbone(x)) -> [B, num_classes] f32."""
    B = x.shape[0]
    x2d = x.reshape(B, -1)                       # == torch.flatten(x, 1)
    in_dim = params["in_dim"]
    assert x2d.shape[1] == in_dim, (x2d.shape, in_dim)

    R, C, Kp = params["R"], params["C"], params["Kp"]
    num_classes = params["num_classes"]
    mode = params["mode"]
    k_tile = params["k_tile"]
    x_item = jnp.dtype(x2d.dtype).itemsize

    vmem_cap_usable = int(0.78 * _vmem_capacity_bytes())

    # ---- batch tiling -----------------------------------------------------
    tile_b = max(8, min(_round_up(batch_tile, 8), _round_up(B, 8)))
    Bp = _round_up(B, tile_b)
    # Keep >=2 grid steps when the batch allows, so the "parallel" axis can be
    # sharded across TensorCores (v7x megacore).
    if Bp // tile_b < 2 and B > 8:
        tile_b = _round_up(pl.cdiv(B, 2), 8)
        Bp = _round_up(B, tile_b)

    def _vmem_needed(tb):
        if mode == "resident":
            return (2 * tb * Kp * x_item                      # x tiles (2 bufs)
                    + 2 * tb * C * 4                          # out tiles (2 bufs)
                    + 2 * (Kp * R * 2 + R * C * 2 + (R + C) * 4)  # weights (<=2 bufs)
                    + tb * R * 4 + tb * Kp * 2)               # h + bf16(x) temps
        return (2 * tb * k_tile * x_item                      # x tiles
                + 2 * k_tile * R * 2                          # streamed w1 tiles
                + 2 * tb * C * 4                              # out tiles
                + 2 * (R * C * 2 + (R + C) * 4)               # resident w2/biases
                + tb * R * 4                                  # f32 acc scratch
                + tb * k_tile * 2)                            # bf16(x) temp

    # Shrink the batch tile if the working set would not fit the VMEM cap.
    while _vmem_needed(tile_b) > vmem_cap_usable and tile_b > 8:
        tile_b = max(8, _round_up(tile_b // 2, 8))
        Bp = _round_up(B, tile_b)

    # Zero-pad batch (and K, only in the K-split mode); padded rows/cols are
    # mathematically inert and sliced off below.
    pad_b, pad_k = Bp - B, Kp - in_dim
    if pad_b or pad_k:
        x2d = jnp.pad(x2d, ((0, pad_b), (0, pad_k)))

    vmem_limit = min(max(int(_vmem_needed(tile_b) * 1.25) + (2 << 20), 16 << 20),
                     vmem_cap_usable)

    cost = pl.CostEstimate(
        flops=2 * Bp * Kp * R + 2 * Bp * R * C,
        transcendentals=0,
        bytes_accessed=(Bp * Kp * x_item + Kp * R * 2 + R * C * 2
                        + (R + C) * 4 + Bp * C * 4),
    )

    def _run(single_buffer_weights):
        if mode == "resident":
            grid = (Bp // tile_b,)
            in_specs = [
                pl.BlockSpec((tile_b, Kp), lambda i: (i, 0)),               # x
                _const_spec((Kp, R), lambda i: (0, 0), single_buffer_weights),
                _const_spec((1, R), lambda i: (0, 0), single_buffer_weights),
                _const_spec((R, C), lambda i: (0, 0), single_buffer_weights),
                _const_spec((1, C), lambda i: (0, 0), single_buffer_weights),
            ]
            out_spec = pl.BlockSpec((tile_b, C), lambda i: (i, 0))
            kernel = _resident_kernel
            scratch = []
            dims = ("parallel",)
        else:
            grid = (Bp // tile_b, Kp // k_tile)
            in_specs = [
                pl.BlockSpec((tile_b, k_tile), lambda i, k: (i, k)),        # x
                pl.BlockSpec((k_tile, R), lambda i, k: (k, 0)),             # w1 streams
                _const_spec((1, R), lambda i, k: (0, 0), single_buffer_weights),
                _const_spec((R, C), lambda i, k: (0, 0), single_buffer_weights),
                _const_spec((1, C), lambda i, k: (0, 0), single_buffer_weights),
            ]
            out_spec = pl.BlockSpec((tile_b, C), lambda i, k: (i, 0))
            kernel = _ksplit_kernel
            scratch = [pltpu.VMEM((tile_b, R), jnp.float32)]
            dims = ("parallel", "arbitrary")

        return pl.pallas_call(
            kernel,
            out_shape=jax.ShapeDtypeStruct((Bp, C), jnp.float32),
            grid=grid,
            in_specs=in_specs,
            out_specs=out_spec,
            scratch_shapes=scratch,
            compiler_params=pltpu.CompilerParams(
                dimension_semantics=dims,
                vmem_limit_bytes=vmem_limit,
            ),
            cost_estimate=cost,
        )(x2d, params["w1"], params["b1"], params["w2"], params["b2"])

    try:
        out_padded = _run(True)
    except Exception:
        # Fallback for Pallas/Mosaic builds that reject pipeline_mode=Buffered
        # on the main pipeline; weights then double-buffer (already accounted
        # for in the VMEM estimate above).
        out_padded = _run(False)

    return out_padded[:B, :num_classes]


def init_params(key, in_dim, representation_dim, num_classes):
    """Deterministic nn.Linear-style init: U(-1/sqrt(fan_in), 1/sqrt(fan_in))."""
    k1, k2, k3, k4 = jax.random.split(key, 4)
    bound1 = 1.0 / jnp.sqrt(in_dim)
    w1 = jax.random.uniform(k1, (in_dim, representation_dim), jnp.float32,
                            -bound1, bound1)
    b1 = jax.random.uniform(k2, (representation_dim,), jnp.float32,
                            -bound1, bound1)
    bound2 = 1.0 / jnp.sqrt(representation_dim)
    w2 = jax.random.uniform(k3, (representation_dim, num_classes), jnp.float32,
                            -bound2, bound2)
    b2 = jax.random.uniform(k4, (num_classes,), jnp.float32, -bound2, bound2)
    return w1, b1, w2, b2


if __name__ == "__main__":
    key = jax.random.PRNGKey(0)
    kx, kp = jax.random.split(key)

    B, Cc, H, W = 2, 4, 16, 16
    representation_dim = 32
    num_classes = 8
    in_dim = Cc * H * W

    x = jax.random.normal(kx, (B, Cc, H, W), jnp.float32)
    w1, b1, w2, b2 = init_params(kp, in_dim, representation_dim, num_classes)

    # Pure-JAX reference with the kernel's bf16 operand rounding, f32 accum.
    x2d = x.reshape(B, in_dim).astype(jnp.bfloat16).astype(jnp.float32)
    w1f = w1.astype(jnp.bfloat16).astype(jnp.float32)
    h = jnp.maximum(
        jnp.dot(x2d, w1f, precision=jax.lax.Precision.HIGHEST) + b1, 0.0)
    hf = h.astype(jnp.bfloat16).astype(jnp.float32)
    w2f = w2.astype(jnp.bfloat16).astype(jnp.float32)
    ref = jnp.dot(hf, w2f, precision=jax.lax.Precision.HIGHEST) + b2

    # 1) Default (resident-w1) path.
    params = prepare_params(w1, b1, w2, b2)   # one-time prep; reuse every call
    out = jax.block_until_ready(spuco_model_forward(x, params))
    assert out.shape == (B, num_classes)
    assert jnp.allclose(out, ref, atol=1e-2, rtol=1e-2), (
        float(jnp.max(jnp.abs(out - ref))))

    # 2) K-split path (forced with a small k_tile so the reduction is tiled),
    #    used automatically when w1 would not fit the per-core VMEM budget.
    params_ks = prepare_params(w1, b1, w2, b2, force_k_split=True, k_tile=256)
    out_ks = jax.block_until_ready(spuco_model_forward(x, params_ks))
    assert out_ks.shape == (B, num_classes)
    assert jnp.allclose(out_ks, ref, atol=1e-2, rtol=1e-2), (
        float(jnp.max(jnp.abs(out_ks - ref))))

    print("KERNEL_OK")
</pallas_src>

<mosaic_0001>
module attributes {stable_mosaic.version = 11 : i64} {
  func.func @_resident_kernel(%arg0: i32, %arg1: memref<8x1024xf32, #tpu.memory_space<vmem>>, %arg2: memref<1024x128xbf16, #tpu.memory_space<vmem>>, %arg3: memref<1x128xf32, #tpu.memory_space<vmem>>, %arg4: memref<128x128xbf16, #tpu.memory_space<vmem>>, %arg5: memref<1x128xf32, #tpu.memory_space<vmem>>, %arg6: memref<8x128xf32, #tpu.memory_space<vmem>>) attributes {dimension_semantics = [#tpu.dimension_semantics<parallel>], iteration_bounds = array<i64: 1>, scalar_prefetch = 0 : i64, scratch_operands = 0 : i64, tpu.core_type = #tpu.core_type<tc>, window_params = [{transform_indices = @transform_0, window_bounds = array<i64: 8, 1024>}, {pipeline_mode = #tpu.pipeline_mode<synchronous>, transform_indices = @transform_1, window_bounds = array<i64: 1024, 128>}, {pipeline_mode = #tpu.pipeline_mode<synchronous>, transform_indices = @transform_2, window_bounds = array<i64: 1, 128>}, {pipeline_mode = #tpu.pipeline_mode<synchronous>, transform_indices = @transform_3, window_bounds = array<i64: 128, 128>}, {pipeline_mode = #tpu.pipeline_mode<synchronous>, transform_indices = @transform_4, window_bounds = array<i64: 1, 128>}, {transform_indices = @transform_5, window_bounds = array<i64: 8, 128>}]} {
    %c0 = arith.constant 0 : index
    %c0_0 = arith.constant 0 : index
    %0 = vector.load %arg1[%c0, %c0_0] : memref<8x1024xf32, #tpu.memory_space<vmem>>, vector<8x1024xf32>
    %1 = arith.truncf %0 : vector<8x1024xf32> to vector<8x1024xbf16>
    %c0_1 = arith.constant 0 : index
    %c0_2 = arith.constant 0 : index
    %2 = vector.load %arg2[%c0_1, %c0_2] : memref<1024x128xbf16, #tpu.memory_space<vmem>>, vector<1024x128xbf16>
    %cst = arith.constant dense<0.000000e+00> : vector<8x128xf32>
    %3 = tpu.matmul %1, %2, %cst {dimension_numbers = #tpu.dot_dimension_numbers<[1], [0], [0], [1], [0, 0, 1, 1], [], []>} : vector<8x1024xbf16>, vector<1024x128xbf16>, vector<8x128xf32> -> vector<8x128xf32>
    %c0_3 = arith.constant 0 : index
    %c0_4 = arith.constant 0 : index
    %4 = vector.load %arg3[%c0_3, %c0_4] : memref<1x128xf32, #tpu.memory_space<vmem>>, vector<1x128xf32>
    %5 = vector.broadcast %4 : vector<1x128xf32> to vector<8x128xf32>
    %6 = arith.addf %3, %5 : vector<8x128xf32>
    %cst_5 = arith.constant 0.000000e+00 : f32
    %7 = vector.broadcast %cst_5 : f32 to vector<8x128xf32>
    %8 = arith.maximumf %6, %7 : vector<8x128xf32>
    %9 = arith.truncf %8 : vector<8x128xf32> to vector<8x128xbf16>
    %c0_6 = arith.constant 0 : index
    %c0_7 = arith.constant 0 : index
    %10 = vector.load %arg4[%c0_6, %c0_7] : memref<128x128xbf16, #tpu.memory_space<vmem>>, vector<128x128xbf16>
    %cst_8 = arith.constant dense<0.000000e+00> : vector<8x128xf32>
    %11 = tpu.matmul %9, %10, %cst_8 {dimension_numbers = #tpu.dot_dimension_numbers<[1], [0], [0], [1], [0, 0, 1, 1], [], []>} : vector<8x128xbf16>, vector<128x128xbf16>, vector<8x128xf32> -> vector<8x128xf32>
    %c0_9 = arith.constant 0 : index
    %c0_10 = arith.constant 0 : index
    %12 = vector.load %arg5[%c0_9, %c0_10] : memref<1x128xf32, #tpu.memory_space<vmem>>, vector<1x128xf32>
    %13 = vector.broadcast %12 : vector<1x128xf32> to vector<8x128xf32>
    %14 = arith.addf %11, %13 : vector<8x128xf32>
    %c0_11 = arith.constant 0 : index
    %c0_12 = arith.constant 0 : index
    %15 = vector.load %arg6[%c0_11, %c0_12] : memref<8x128xf32, #tpu.memory_space<vmem>>, vector<8x128xf32>
    tpu.vector_store %arg6[%c0_11, %c0_12], %14 {strides = array<i32>} : memref<8x128xf32, #tpu.memory_space<vmem>>, vector<8x128xf32>,
    return
  }
  func.func @transform_0(%arg0: i32) -> (i32, i32) {
    %c0_i32 = arith.constant 0 : i32
    %c0_i32_0 = arith.constant 0 : i32
    return %arg0, %c0_i32 : i32, i32
  }
  func.func @transform_1(%arg0: i32) -> (i32, i32) {
    %c0_i32 = arith.constant 0 : i32
    %c0_i32_0 = arith.constant 0 : i32
    %c0_i32_1 = arith.constant 0 : i32
    return %c0_i32, %c0_i32_0 : i32, i32
  }
  func.func @transform_2(%arg0: i32) -> (i32, i32) {
    %c0_i32 = arith.constant 0 : i32
    %c0_i32_0 = arith.constant 0 : i32
    %c0_i32_1 = arith.constant 0 : i32
    return %c0_i32, %c0_i32_0 : i32, i32
  }
  func.func @transform_3(%arg0: i32) -> (i32, i32) {
    %c0_i32 = arith.constant 0 : i32
    %c0_i32_0 = arith.constant 0 : i32
    %c0_i32_1 = arith.constant 0 : i32
    return %c0_i32, %c0_i32_0 : i32, i32
  }
  func.func @transform_4(%arg0: i32) -> (i32, i32) {
    %c0_i32 = arith.constant 0 : i32
    %c0_i32_0 = arith.constant 0 : i32
    %c0_i32_1 = arith.constant 0 : i32
    return %c0_i32, %c0_i32_0 : i32, i32
  }
  func.func @transform_5(%arg0: i32) -> (i32, i32) {
    %c0_i32 = arith.constant 0 : i32
    %c0_i32_0 = arith.constant 0 : i32
    return %arg0, %c0_i32 : i32, i32
  }
}

module attributes {stable_mosaic.version = 11 : i64} {
  func.func @_resident_kernel(%arg0: i32, %arg1: memref<8x1024xf32, #tpu.memory_space<vmem>>, %arg2: memref<1024x128xbf16, #tpu.memory_space<vmem>>, %arg3: memref<1x128xf32, #tpu.memory_space<vmem>>, %arg4: memref<128x128xbf16, #tpu.memory_space<vmem>>, %arg5: memref<1x128xf32, #tpu.memory_space<vmem>>, %arg6: memref<8x128xf32, #tpu.memory_space<vmem>>) attributes {dimension_semantics = [#tpu.dimension_semantics<parallel>], iteration_bounds = array<i64: 1>, scalar_prefetch = 0 : i64, scratch_operands = 0 : i64, tpu.core_type = #tpu.core_type<tc>, window_params = [{transform_indices = @transform_0, window_bounds = array<i64: 8, 1024>}, {pipeline_mode = #tpu.pipeline_mode<synchronous>, transform_indices = @transform_1, window_bounds = array<i64: 1024, 128>}, {pipeline_mode = #tpu.pipeline_mode<synchronous>, transform_indices = @transform_2, window_bounds = array<i64: 1, 128>}, {pipeline_mode = #tpu.pipeline_mode<synchronous>, transform_indices = @transform_3, window_bounds = array<i64: 128, 128>}, {pipeline_mode = #tpu.pipeline_mode<synchronous>, transform_indices = @transform_4, window_bounds = array<i64: 1, 128>}, {transform_indices = @transform_5, window_bounds = array<i64: 8, 128>}]} {
    %c0 = arith.constant 0 : index
    %c0_0 = arith.constant 0 : index
    %0 = vector.load %arg1[%c0, %c0_0] : memref<8x1024xf32, #tpu.memory_space<vmem>>, vector<8x1024xf32>
    %1 = arith.truncf %0 : vector<8x1024xf32> to vector<8x1024xbf16>
    %c0_1 = arith.constant 0 : index
    %c0_2 = arith.constant 0 : index
    %2 = vector.load %arg2[%c0_1, %c0_2] : memref<1024x128xbf16, #tpu.memory_space<vmem>>, vector<1024x128xbf16>
    %cst = arith.constant dense<0.000000e+00> : vector<8x128xf32>
    %3 = tpu.matmul %1, %2, %cst {dimension_numbers = #tpu.dot_dimension_numbers<[1], [0], [0], [1], [0, 0, 1, 1], [], []>} : vector<8x1024xbf16>, vector<1024x128xbf16>, vector<8x128xf32> -> vector<8x128xf32>
    %c0_3 = arith.constant 0 : index
    %c0_4 = arith.constant 0 : index
    %4 = vector.load %arg3[%c0_3, %c0_4] : memref<1x128xf32, #tpu.memory_space<vmem>>, vector<1x128xf32>
    %5 = vector.broadcast %4 : vector<1x128xf32> to vector<8x128xf32>
    %6 = arith.addf %3, %5 : vector<8x128xf32>
    %cst_5 = arith.constant 0.000000e+00 : f32
    %7 = vector.broadcast %cst_5 : f32 to vector<8x128xf32>
    %8 = arith.maximumf %6, %7 : vector<8x128xf32>
    %9 = arith.truncf %8 : vector<8x128xf32> to vector<8x128xbf16>
    %c0_6 = arith.constant 0 : index
    %c0_7 = arith.constant 0 : index
    %10 = vector.load %arg4[%c0_6, %c0_7] : memref<128x128xbf16, #tpu.memory_space<vmem>>, vector<128x128xbf16>
    %cst_8 = arith.constant dense<0.000000e+00> : vector<8x128xf32>
    %11 = tpu.matmul %9, %10, %cst_8 {dimension_numbers = #tpu.dot_dimension_numbers<[1], [0], [0], [1], [0, 0, 1, 1], [], []>} : vector<8x128xbf16>, vector<128x128xbf16>, vector<8x128xf32> -> vector<8x128xf32>
    %c0_9 = arith.constant 0 : index
    %c0_10 = arith.constant 0 : index
    %12 = vector.load %arg5[%c0_9, %c0_10] : memref<1x128xf32, #tpu.memory_space<vmem>>, vector<1x128xf32>
    %13 = vector.broadcast %12 : vector<1x128xf32> to vector<8x128xf32>
    %14 = arith.addf %11, %13 : vector<8x128xf32>
    %c0_11 = arith.constant 0 : index
    %c0_12 = arith.constant 0 : index
    %15 = vector.load %arg6[%c0_11, %c0_12] : memref<8x128xf32, #tpu.memory_space<vmem>>, vector<8x128xf32>
    tpu.vector_store %arg6[%c0_11, %c0_12], %14 {strides = array<i32>} : memref<8x128xf32, #tpu.memory_space<vmem>>, vector<8x128xf32>,
    return
  }
  func.func @transform_0(%arg0: i32) -> (i32, i32) {
    %c0_i32 = arith.constant 0 : i32
    %c0_i32_0 = arith.constant 0 : i32
    return %arg0, %c0_i32 : i32, i32
  }
  func.func @transform_1(%arg0: i32) -> (i32, i32) {
    %c0_i32 = arith.constant 0 : i32
    %c0_i32_0 = arith.constant 0 : i32
    %c0_i32_1 = arith.constant 0 : i32
    return %c0_i32, %c0_i32_0 : i32, i32
  }
  func.func @transform_2(%arg0: i32) -> (i32, i32) {
    %c0_i32 = arith.constant 0 : i32
    %c0_i32_0 = arith.constant 0 : i32
    %c0_i32_1 = arith.constant 0 : i32
    return %c0_i32, %c0_i32_0 : i32, i32
  }
  func.func @transform_3(%arg0: i32) -> (i32, i32) {
    %c0_i32 = arith.constant 0 : i32
    %c0_i32_0 = arith.constant 0 : i32
    %c0_i32_1 = arith.constant 0 : i32
    return %c0_i32, %c0_i32_0 : i32, i32
  }
  func.func @transform_4(%arg0: i32) -> (i32, i32) {
    %c0_i32 = arith.constant 0 : i32
    %c0_i32_0 = arith.constant 0 : i32
    %c0_i32_1 = arith.constant 0 : i32
    return %c0_i32, %c0_i32_0 : i32, i32
  }
  func.func @transform_5(%arg0: i32) -> (i32, i32) {
    %c0_i32 = arith.constant 0 : i32
    %c0_i32_0 = arith.constant 0 : i32
    return %arg0, %c0_i32 : i32, i32
  }
}

</mosaic_0001>

<bundles_post_ra>
// kernel: tpu_custom_call.1
= control target key start
LH: loop header
LB: loop body
LE: loop exit
PB: predicated region body
PF: predicated region fallthrough
CT: control target
= control target key end

     0   :  { %10 = vsyncpa [#allocation3], 0  ;;  %s1349_s0 = inlined_call_operand.hbm [shape: f32[8,1024], index: 0, kind: input, shape index: {}]   ;;  %s1350_s1 = inlined_call_operand.hbm [shape: bf16[1024,128], index: 1, kind: input, shape index: {}]   ;;  %s1351_s2 = inlined_call_operand.vmem [shape: f32[1,128], index: 2, kind: input, shape index: {}]   ;;  %s1352_s3 = inlined_call_operand.hbm [shape: bf16[128,128], index: 3, kind: input, shape index: {}]   ;;  %s1353_s4 = inlined_call_operand.vmem [shape: f32[1,128], index: 4, kind: input, shape index: {}]   ;;  %s1354_s5 = inlined_call_operand.hbm [shape: f32[8,128], index: 5, kind: output, shape index: {}]  }
   0x1   :  { %11 = vsyncpa [#allocation6], 0 }
   0x2   :  { %12 = vsyncpa [#allocation4], 0  ;;  %s1251_s18 = smov [#allocation5]   ;;  %s1157_s22 = scalar_lea.hbm %s1350_s1, 8192 }
   0x3   :  { %s28_s19 = sshll.u32 %s1251_s18, 4  ;;  %p1158_p0 = scmp.ne.s32.totalorder %s1350_s1, %s1157_s22  ;;  %s29_s19 = int_to_ptr.vmem [resolvable:$true] %s28_s19 }
   0x4   :  { %p1161_p1 = scmp.lt.u32.totalorder %s1157_s22, %s1350_s1 }
   0x6   :  { %p1163_p2 = pnand %p1161_p1, %p1158_p0 }
   0x8   :  { %1166 = shalt.err (!%p1163_p2)
}
   0x9   :  { %s1167_s27 = scalar_lea.vmem %s29_s19, 8192  ;;  %p1172_p4 = scmp.lt.s32.totalorder %s29_s19, %s29_s19 }
   0xa   :  { %p1168_p3 = scmp.ne.s32.totalorder %s29_s19, %s1167_s27  ;;  %p1173_p5 = scmp.lt.s32.totalorder %s1167_s27, %s1167_s27 }
   0xc   :  { %p1174_p6 = por %p1173_p5, %p1172_p4 }
   0xe   :  { %p1175_p7 = pnand %p1174_p6, %p1168_p3 }
  0x10   :  { %1178 = shalt.err (!%p1175_p7)
}
  0x11   :  { %s1252_s28 = smov 64   ;;  %s1253_s29 = smov 4  }
  0x12   :  { %34 = dma.hbm_to_vmem [thread:$0]  %s1350_s1, 8192, %s29_s19, [#allocation6], %s1252_s28, %s1252_s28, %s1253_s29  }
  0x13   :  { %s1254_s7 = smov [#allocation2]   ;;  %s1255_s9 = smov [#allocation7]  }
  0x14   :  { %s19_s8 = sshll.u32 %s1254_s7, 4  ;;  %s42_s10 = sshll.u32 %s1255_s9, 4  ;;  %s20_s8 = int_to_ptr.vmem [resolvable:$true] %s19_s8  ;;  %s43_s10 = int_to_ptr.vmem [resolvable:$true] %s42_s10 }
  0x15   :  { %s1179_s13 = scalar_lea.hbm %s1349_s0, 1024 }
  0x16   :  { %p1180_p8 = scmp.ne.s32.totalorder %s1349_s0, %s1179_s13  ;;  %p1183_p9 = scmp.lt.u32.totalorder %s1179_s13, %s1349_s0 }
  0x18   :  { %p1185_p10 = pnand %p1183_p9, %p1180_p8 }
  0x1a   :  { %1188 = shalt.err (!%p1185_p10)
}
  0x1b   :  { %s1189_s1 = scalar_lea.vmem %s20_s8, 1024  ;;  %p1194_p12 = scmp.lt.s32.totalorder %s20_s8, %s20_s8 }
  0x1c   :  { %p1190_p11 = scmp.ne.s32.totalorder %s20_s8, %s1189_s1  ;;  %p1195_p13 = scmp.lt.s32.totalorder %s1189_s1, %s1189_s1 }
  0x1e   :  { %p1196_p0 = por %p1195_p13, %p1194_p12 }
  0x20   :  { %p1197_p1 = pnand %p1196_p0, %p1190_p11 }
  0x22   :  { %1200 = shalt.err (!%p1197_p1)
}
  0x23   :  { %22 = dma.hbm_to_vmem [thread:$0]  %s1349_s0, 1024, %s20_s8, [#allocation3]  }
  0x24   :  { %s1201_s22 = scalar_lea.hbm %s1352_s3, 1024 }
  0x25   :  { %p1202_p2 = scmp.ne.s32.totalorder %s1352_s3, %s1201_s22  ;;  %p1205_p3 = scmp.lt.u32.totalorder %s1201_s22, %s1352_s3 }
  0x27   :  { %p1207_p4 = pnand %p1205_p3, %p1202_p2 }
  0x29   :  { %1210 = shalt.err (!%p1207_p4)
}
  0x2a   :  { %s1211_s27 = scalar_lea.vmem %s43_s10, 1024  ;;  %p1216_p6 = scmp.lt.s32.totalorder %s43_s10, %s43_s10 }
  0x2b   :  { %p1212_p5 = scmp.ne.s32.totalorder %s43_s10, %s1211_s27  ;;  %p1217_p7 = scmp.lt.s32.totalorder %s1211_s27, %s1211_s27 }
  0x2d   :  { %p1218_p8 = por %p1217_p7, %p1216_p6 }
  0x2f   :  { %p1219_p9 = pnand %p1218_p8, %p1212_p5 }
  0x31   :  { %1222 = shalt.err (!%p1219_p9)
}
  0x32   :  { %48 = dma.hbm_to_vmem [thread:$0]  %s1352_s3, 1024, %s43_s10, [#allocation6], %s1252_s28, %s1252_s28, %s1253_s29  }
  0x33   :  { %1245 = dma.done.wait [#allocation3], 1024  }
  0x34   :  { %1246 = vsyncadd [#allocation3], 4294966272 }
  0x35   :  { %1247 = dma.done.wait [#allocation6], 9216  }
  0x36   :  { %1248 = vsyncadd [#allocation6], 4294958080  ;;  %v1085_v0 = vld [vmem:[#allocation5 + $0x40] sm:$0xff]   ;;  %v1089_v4 = vld [vmem:[#allocation5 + $0x48] sm:$0xff]   ;;  %vm1257_vm0 = vmmov 0   ;;  %s1258_s6 = smov [#allocation8]  }
  0x37   :  { %v1086_v1 = vld [vmem:[#allocation5 + $0xc0] sm:$0xff]   ;;  %960 = vmatprep.subr.bf16.mxu0 %v1085_v0  ;;  %v1090_v5 = vld [vmem:[#allocation5 + $0xc8] sm:$0xff]   ;;  %v1093_v8 = vld [vmem:[#allocation5 + $0x50] sm:$0xff]   ;;  %s876_s7 = sshll.u32 %s1258_s6, 4  ;;  %s877_s7 = int_to_ptr.vmem [resolvable:$true] %s876_s7 }
  0x38   :  { %v1087_v2 = vld [vmem:[#allocation5] sm:$0xff]   ;;  %982 = vmatprep.subr.bf16.mxu1 %v1086_v1  ;;  %v1091_v6 = vld [vmem:[#allocation5 + $0x8] sm:$0xff]   ;;  %v1094_v9 = vld [vmem:[#allocation5 + $0xd0] sm:$0xff]   ;;  %s1223_s8 = scalar_lea.vmem %s877_s7, 128  ;;  %p1228_p11 = scmp.lt.s32.totalorder %s877_s7, %s877_s7 }
  0x39   :  { %v1088_v3 = vld [vmem:[#allocation5 + $0x80] sm:$0xff]   ;;  %961 = vmatpush3.bf16.msra.mxu0 %v1087_v2  ;;  %v1092_v7 = vld [vmem:[#allocation5 + $0x88] sm:$0xff]   ;;  %v1095_v10 = vld [vmem:[#allocation5 + $0x10] sm:$0xff]   ;;  %p1224_p10 = scmp.ne.s32.totalorder %s877_s7, %s1223_s8  ;;  %p1229_p12 = scmp.lt.s32.totalorder %s1223_s8, %s1223_s8 }
  0x3a   :  { %983 = vmatpush3.bf16.msra.mxu1 %v1088_v3  ;;  %962 = vmatprep.subr.bf16.mxu0 %v1089_v4  ;;  %v1096_v11 = vld [vmem:[#allocation5 + $0x90] sm:$0xff]   ;;  %v1097_v12 = vld [vmem:[#allocation5 + $0x58] sm:$0xff]   ;;  %v1101_v16 = vld [vmem:[#allocation5 + $0x60] sm:$0xff]  }
  0x3b   :  { %984 = vmatprep.subr.bf16.mxu1 %v1090_v5  ;;  %v1098_v13 = vld [vmem:[#allocation5 + $0xd8] sm:$0xff]   ;;  %v1102_v17 = vld [vmem:[#allocation5 + $0xe0] sm:$0xff]   ;;  %v1105_v20 = vld [vmem:[#allocation5 + $0x68] sm:$0xff]   ;;  %p1230_p13 = por %p1229_p12, %p1228_p11 }
  0x3c   :  { %v1099_v14 = vld [vmem:[#allocation5 + $0x18] sm:$0xff]   ;;  %v1103_v18 = vld [vmem:[#allocation5 + $0x20] sm:$0xff]   ;;  %v1106_v21 = vld [vmem:[#allocation5 + $0xe8] sm:$0xff]  }
  0x3d   :  { %963 = vmatpush3.bf16.msra.mxu0 %v1091_v6  ;;  %v1100_v15 = vld [vmem:[#allocation5 + $0x98] sm:$0xff]   ;;  %v1104_v19 = vld [vmem:[#allocation5 + $0xa0] sm:$0xff]   ;;  %v1107_v22 = vld [vmem:[#allocation5 + $0x28] sm:$0xff]   ;;  %p1231_p0 = pnand %p1230_p13, %p1224_p10 }
  0x3e   :  { %985 = vmatpush3.bf16.msra.mxu1 %v1092_v7  ;;  %964 = vmatprep.subr.bf16.mxu0 %v1093_v8  ;;  %v1108_v23 = vld [vmem:[#allocation5 + $0xa8] sm:$0xff]   ;;  %v1109_v24 = vld [vmem:[#allocation5 + $0x70] sm:$0xff]   ;;  %v1113_v28 = vld [vmem:[#allocation5 + $0x78] sm:$0xff]  }
  0x3f   :  { %986 = vmatprep.subr.bf16.mxu1 %v1094_v9  ;;  %v1110_v25 = vld [vmem:[#allocation5 + $0xf0] sm:$0xff]   ;;  %v1114_v29 = vld [vmem:[#allocation5 + $0xf8] sm:$0xff]   ;;  %v62_v32 = vld [vmem:[#allocation2 + $0x8] sm:$0xff] }
  0x40   :  { %v1111_v26 = vld [vmem:[#allocation5 + $0x30] sm:$0xff]   ;;  %v1115_v30 = vld [vmem:[#allocation5 + $0x38] sm:$0xff]   ;;  %v61_v34 = vld [vmem:[#allocation2] sm:$0xff]  ;;  %v70_v35 = vpack.c.bf16 %v62_v32, %v62_v32 }
  0x41   :  { %965 = vmatpush3.bf16.msra.mxu0 %v1095_v10  ;;  %v1112_v27 = vld [vmem:[#allocation5 + $0xb0] sm:$0xff]   ;;  %v1116_v31 = vld [vmem:[#allocation5 + $0xb8] sm:$0xff]   ;;  %v69_v37 = vpack.c.bf16 %v61_v34, %v61_v34  ;;  %v1117_v40 = vld [vmem:[#allocation5 + $0x140] sm:$0xff]  }
  0x42   :  { %987 = vmatpush3.bf16.msra.mxu1 %v1096_v11  ;;  %966 = vmatprep.subr.bf16.mxu0 %v1097_v12  ;;  %v64_v33 = vld [vmem:[#allocation2 + $0x18] sm:$0xff]  ;;  %v63_v38 = vld [vmem:[#allocation2 + $0x10] sm:$0xff]  ;;  %v1118_v41 = vld [vmem:[#allocation5 + $0x1c0] sm:$0xff]  }
  0x43   :  { %988 = vmatprep.subr.bf16.mxu1 %v1098_v13  ;;  %v72_v36 = vpack.c.bf16 %v64_v33, %v64_v33  ;;  %v71_v39 = vpack.c.bf16 %v63_v38, %v63_v38  ;;  %628 = vmatprep.mubr.bf16.mxu0 %v70_v35  ;;  %v1119_v42 = vld [vmem:[#allocation5 + $0x100] sm:$0xff]   ;;  %v1121_v44 = vld [vmem:[#allocation5 + $0x148] sm:$0xff]   ;;  %v1125_v48 = vld [vmem:[#allocation5 + $0x150] sm:$0xff]  }
  0x44   :  { %v1120_v43 = vld [vmem:[#allocation5 + $0x180] sm:$0xff]   ;;  %v1122_v45 = vld [vmem:[#allocation5 + $0x1c8] sm:$0xff]   ;;  %v1126_v49 = vld [vmem:[#allocation5 + $0x1d0] sm:$0xff]  }
  0x45   :  { %967 = vmatpush3.bf16.msra.mxu0 %v1099_v14  ;;  %668 = vmatprep.mubr.bf16.mxu1 %v72_v36  ;;  %v1123_v46 = vld [vmem:[#allocation5 + $0x108] sm:$0xff]   ;;  %v1127_v50 = vld [vmem:[#allocation5 + $0x110] sm:$0xff]   ;;  %v1129_v52 = vld [vmem:[#allocation5 + $0x158] sm:$0xff]  }
  0x46   :  { %989 = vmatpush3.bf16.msra.mxu1 %v1100_v15  ;;  %968 = vmatprep.subr.bf16.mxu0 %v1101_v16  ;;  %v1124_v47 = vld [vmem:[#allocation5 + $0x188] sm:$0xff]   ;;  %v1128_v51 = vld [vmem:[#allocation5 + $0x190] sm:$0xff]   ;;  %v1130_v53 = vld [vmem:[#allocation5 + $0x1d8] sm:$0xff]  }
  0x47   :  { %990 = vmatprep.subr.bf16.mxu1 %v1102_v17  ;;  %v1131_v54 = vld [vmem:[#allocation5 + $0x118] sm:$0xff]   ;;  %v1133_v56 = vld [vmem:[#allocation5 + $0x160] sm:$0xff]   ;;  %v1137_v60 = vld [vmem:[#allocation5 + $0x168] sm:$0xff]   ;;  %v1256_v17 = vmov 0.0  }
  0x48   :  { %v1132_v55 = vld [vmem:[#allocation5 + $0x198] sm:$0xff]   ;;  %v1134_v57 = vld [vmem:[#allocation5 + $0x1e0] sm:$0xff]   ;;  %v1138_v61 = vld [vmem:[#allocation5 + $0x1e8] sm:$0xff]  }
  0x49   :  { %969 = vmatpush3.bf16.msra.mxu0 %v1103_v18  ;;  %v1135_v58 = vld [vmem:[#allocation5 + $0x120] sm:$0xff]   ;;  %v1139_v62 = vld [vmem:[#allocation5 + $0x128] sm:$0xff]   ;;  %v1141_v0 = vld [vmem:[#allocation5 + $0x170] sm:$0xff]  }
  0x4a   :  { %991 = vmatpush3.bf16.msra.mxu1 %v1104_v19  ;;  %970 = vmatprep.subr.bf16.mxu0 %v1105_v20  ;;  %v1136_v59 = vld [vmem:[#allocation5 + $0x1a0] sm:$0xff]   ;;  %v1140_v63 = vld [vmem:[#allocation5 + $0x1a8] sm:$0xff]   ;;  %v1142_v1 = vld [vmem:[#allocation5 + $0x1f0] sm:$0xff]  }
  0x4b   :  { %992 = vmatprep.subr.bf16.mxu1 %v1106_v21  ;;  %v1143_v2 = vld [vmem:[#allocation5 + $0x130] sm:$0xff]   ;;  %v1145_v4 = vld [vmem:[#allocation5 + $0x178] sm:$0xff]   ;;  %v66_v8 = vld [vmem:[#allocation2 + $0x28] sm:$0xff] }
  0x4c   :  { %v1144_v3 = vld [vmem:[#allocation5 + $0x1b0] sm:$0xff]   ;;  %v1146_v5 = vld [vmem:[#allocation5 + $0x1f8] sm:$0xff]   ;;  %v74_v10 = vpack.c.bf16 %v66_v8, %v66_v8  ;;  %v65_v12 = vld [vmem:[#allocation2 + $0x20] sm:$0xff] }
  0x4d   :  { %971 = vmatpush3.bf16.msra.mxu0 %v1107_v22  ;;  %v1147_v6 = vld [vmem:[#allocation5 + $0x138] sm:$0xff]   ;;  %v67_v13 = vld [vmem:[#allocation2 + $0x30] sm:$0xff]  ;;  %v73_v14 = vpack.c.bf16 %v65_v12, %v65_v12  ;;  %v1149_v16 = vld [vmem:[#allocation7] sm:$0xff]  }
  0x4e   :  { %993 = vmatpush3.bf16.msra.mxu1 %v1108_v23  ;;  %972 = vmatprep.subr.bf16.mxu0 %v1109_v24  ;;  %v1148_v7 = vld [vmem:[#allocation5 + $0x1b8] sm:$0xff]   ;;  %v75_v15 = vpack.c.bf16 %v67_v13, %v67_v13  ;;  %v1150_v18 = vld [vmem:[#allocation7 + $0x8] sm:$0xff]   ;;  %v1151_v19 = vld [vmem:[#allocation7 + $0x10] sm:$0xff]  }
  0x4f   :  { %994 = vmatprep.subr.bf16.mxu1 %v1110_v25  ;;  %v68_v9 = vld [vmem:[#allocation2 + $0x38] sm:$0xff]  ;;  %v1153_v21 = vld [vmem:[#allocation7 + $0x20] sm:$0xff]   ;;  %v1154_v22 = vld [vmem:[#allocation7 + $0x28] sm:$0xff]  }
  0x50   :  { %v76_v11 = vpack.c.bf16 %v68_v9, %v68_v9  ;;  %v1152_v20 = vld [vmem:[#allocation7 + $0x18] sm:$0xff]   ;;  %v1155_v23 = vld [vmem:[#allocation7 + $0x30] sm:$0xff]  }
  0x51   :  { %973 = vmatpush3.bf16.msra.mxu0 %v1111_v26  ;;  %v1156_v24 = vld [vmem:[#allocation7 + $0x38] sm:$0xff]  }
  0x52   :  { %995 = vmatpush3.bf16.msra.mxu1 %v1112_v27  ;;  %974 = vmatprep.subr.bf16.mxu0 %v1113_v28  ;;  %v886_v27 = vld [vmem:[%s1351_s2] ss:$0 sm:$0xff] }
  0x53   :  { %996 = vmatprep.subr.bf16.mxu1 %v1114_v29 }
  0x55   :  { %975 = vmatpush3.bf16.msra.mxu0 %v1115_v30 }
  0x56   :  { %997 = vmatpush3.bf16.msra.mxu1 %v1116_v31  ;;  %1004 = vmatprep.subr.bf16.mxu0 %v1117_v40 }
  0x57   :  { %1026 = vmatprep.subr.bf16.mxu1 %v1118_v41 }
  0x58   :  { %629 = vmatmul.mubr.bf16.vlgmr.msra.gmra.mrb[0].mxu0 %v69_v37 }
  0x59   :  { %669 = vmatmul.mubr.bf16.vlgmr.msra.gmra.mrb[0].mxu1 %v71_v39  ;;  %1005 = vmatpush3.bf16.msra.mxu0 %v1119_v42 }
  0x5a   :  { %1027 = vmatpush3.bf16.msra.mxu1 %v1120_v43  ;;  %1006 = vmatprep.subr.bf16.mxu0 %v1121_v44 }
  0x5b   :  { %1028 = vmatprep.subr.bf16.mxu1 %v1122_v45  ;;  %708 = vmatprep.mubr.bf16.mxu0 %v74_v10 }
  0x5c   :  { %748 = vmatprep.mubr.bf16.mxu1 %v76_v11 }
  0x5d   :  { %1007 = vmatpush3.bf16.msra.mxu0 %v1123_v46 }
  0x5e   :  { %1029 = vmatpush3.bf16.msra.mxu1 %v1124_v47  ;;  %1008 = vmatprep.subr.bf16.mxu0 %v1125_v48 }
  0x5f   :  { %1030 = vmatprep.subr.bf16.mxu1 %v1126_v49 }
  0x61   :  { %1009 = vmatpush3.bf16.msra.mxu0 %v1127_v50 }
  0x62   :  { %1031 = vmatpush3.bf16.msra.mxu1 %v1128_v51  ;;  %1010 = vmatprep.subr.bf16.mxu0 %v1129_v52  ;;  %v951_v52 = vld [vmem:[%s1353_s4] ss:$0 sm:$0xff] }
  0x63   :  { %1032 = vmatprep.subr.bf16.mxu1 %v1130_v53 }
  0x65   :  { %1011 = vmatpush3.bf16.msra.mxu0 %v1131_v54 }
  0x66   :  { %1033 = vmatpush3.bf16.msra.mxu1 %v1132_v55  ;;  %1012 = vmatprep.subr.bf16.mxu0 %v1133_v56 }
  0x67   :  { %1034 = vmatprep.subr.bf16.mxu1 %v1134_v57 }
  0x69   :  { %1013 = vmatpush3.bf16.msra.mxu0 %v1135_v58 }
  0x6a   :  { %1035 = vmatpush3.bf16.msra.mxu1 %v1136_v59  ;;  %1014 = vmatprep.subr.bf16.mxu0 %v1137_v60 }
  0x6b   :  { %1036 = vmatprep.subr.bf16.mxu1 %v1138_v61 }
  0x6d   :  { %1015 = vmatpush3.bf16.msra.mxu0 %v1139_v62 }
  0x6e   :  { %1037 = vmatpush3.bf16.msra.mxu1 %v1140_v63  ;;  %1016 = vmatprep.subr.bf16.mxu0 %v1141_v0 }
  0x6f   :  { %1038 = vmatprep.subr.bf16.mxu1 %v1142_v1 }
  0x71   :  { %1017 = vmatpush3.bf16.msra.mxu0 %v1143_v2 }
  0x72   :  { %1039 = vmatpush3.bf16.msra.mxu1 %v1144_v3  ;;  %1018 = vmatprep.subr.bf16.mxu0 %v1145_v4 }
  0x73   :  { %1040 = vmatprep.subr.bf16.mxu1 %v1146_v5 }
  0x75   :  { %1019 = vmatpush3.bf16.msra.mxu0 %v1147_v6 }
  0x76   :  { %1041 = vmatpush3.bf16.msra.mxu1 %v1148_v7  ;;  %1057 = vmatprep.subr.bf16.mxu0 %v1256_v17 }
  0x78   :  { %709 = vmatmul.mubr.bf16.vlgmr.msra.gmra.mrb[4].mxu0 %v73_v14 }
  0x79   :  { %749 = vmatmul.mubr.bf16.vlgmr.msra.gmra.mrb[4].mxu1 %v75_v15  ;;  %1058 = vmatpush3.bf16.msra.mxu0 %v1149_v16 }
  0x7a   :  { %1059 = vmatprep.subr.bf16.mxu0 %v1256_v17  ;;  %1073 = vmatprep.mubr.msk.bf16.mxu0 %vm1257_vm0, %v1256_v17 }
  0x7d   :  { %1060 = vmatpush3.bf16.msra.mxu0 %v1150_v18 }
  0x7e   :  { %1061 = vmatprep.subr.bf16.mxu0 %v1256_v17 }
  0x81   :  { %1062 = vmatpush3.bf16.msra.mxu0 %v1151_v19 }
  0x82   :  { %1063 = vmatprep.subr.bf16.mxu0 %v1256_v17 }
  0x85   :  { %1064 = vmatpush3.bf16.msra.mxu0 %v1152_v20 }
  0x86   :  { %1065 = vmatprep.subr.bf16.mxu0 %v1256_v17 }
  0x89   :  { %1066 = vmatpush3.bf16.msra.mxu0 %v1153_v21 }
  0x8a   :  { %1067 = vmatprep.subr.bf16.mxu0 %v1256_v17 }
  0x8d   :  { %1068 = vmatpush3.bf16.msra.mxu0 %v1154_v22 }
  0x8e   :  { %1069 = vmatprep.subr.bf16.mxu0 %v1256_v17 }
  0x91   :  { %1070 = vmatpush3.bf16.msra.mxu0 %v1155_v23 }
  0x92   :  { %1071 = vmatprep.subr.bf16.mxu0 %v1256_v17 }
  0x95   :  { %1072 = vmatpush3.bf16.msra.mxu0 %v1156_v24 }
 0x12b   :  { %v976_v25 = vpop.f32.mrb[0].mxu0 }
 0x12c   :  { %v998_v26 = vpop.f32.mrb[0].mxu1  ;;  %v977_v28 = vpop.f32.mrb[1].mxu0 }
 0x12d   :  { %v999_v29 = vpop.f32.mrb[1].mxu1  ;;  %v978_v30 = vadd.f32 %v977_v28, %v976_v25  ;;  %v979_v32 = vpop.f32.mrb[2].mxu0 }
 0x12e   :  { %v1000_v31 = vadd.f32 %v999_v29, %v998_v26  ;;  %v1001_v33 = vpop.f32.mrb[2].mxu1  ;;  %v980_v34 = vpop.f32.mrb[3].mxu0 }
 0x12f   :  { %v1002_v35 = vpop.f32.mrb[3].mxu1  ;;  %v631_v36 = vadd.f32 %v978_v30, %v886_v27 }
 0x131   :  { %v671_v37 = vadd.f32 %v1000_v31, %v631_v36 }
 0x14b   :  { %v1020_v38 = vpop.f32.mrb[4].mxu0 }
 0x14c   :  { %v1042_v39 = vpop.f32.mrb[4].mxu1  ;;  %v1021_v40 = vpop.f32.mrb[5].mxu0 }
 0x14d   :  { %v1022_v41 = vadd.f32 %v1021_v40, %v1020_v38  ;;  %v1043_v42 = vpop.f32.mrb[5].mxu1  ;;  %v1023_v43 = vpop.f32.mrb[6].mxu0 }
 0x14e   :  { %v1044_v44 = vadd.f32 %v1043_v42, %v1042_v39  ;;  %v1045_v45 = vpop.f32.mrb[6].mxu1  ;;  %v1024_v46 = vpop.f32.mrb[7].mxu0 }
 0x14f   :  { %v711_v47 = vadd.f32 %v1022_v41, %v671_v37  ;;  %v1046_v48 = vpop.f32.mrb[7].mxu1 }
 0x151   :  { %v751_v49 = vadd.f32 %v1044_v44, %v711_v47 }
 0x153   :  { %v756_v50 = vmax.f32 %v751_v49, 0.0 }
 0x155   :  { %v757_v51 = vpack.c.bf16 %v756_v50, %v756_v50 }
 0x157   :  { %1074 = vmatmul.mubr.bf16.vlgmr.msra.gmra.mrb[8].mxu0 %v757_v51 }
 0x22a   :  { %v863_v53 = vpop.f32.mrb[8].mxu0 }
 0x22b   :  { %v864_v54 = vadd.f32 %v951_v52, %v863_v53  ;;  %v1075_v55 = vpop.f32.mrb[9].mxu0 }
 0x22c   :  { %v866_v56 = vpop.f32.mrb[10].mxu0 }
 0x22d   :  { %869 = vst [vmem:[#allocation8] sm:$0xff] %v864_v54  ;;  %v1076_v57 = vpop.f32.mrb[11].mxu0 }
 0x22e   :  { %1234 = shalt.err (!%p1231_p0)
}
 0x22f   :  { %s1235_s4 = scalar_lea.hbm %s1354_s5, 128 }
 0x230   :  { %p1236_p1 = scmp.ne.s32.totalorder %s1354_s5, %s1235_s4  ;;  %p1239_p2 = scmp.lt.u32.totalorder %s1235_s4, %s1354_s5 }
 0x232   :  { %p1241_p3 = pnand %p1239_p2, %p1236_p1 }
 0x234   :  { %1244 = shalt.err (!%p1241_p3)
}
 0x235   :  { %879 = dma.vmem_to_hbm [thread:$0]  %s877_s7, 128, %s1354_s5, [#allocation4]  }
 0x236   :  { %1249 = dma.done.wait [#allocation4], 128  }
 0x237   :  { %1250 = vsyncadd [#allocation4], 4294967168 }
 0x238   :  { %883 = vsyncpa [#allocation3], 1 }
 0x239   :  { %884 = vsyncpa [#allocation6], 1 }
 0x23a   :  { %885 = vsyncpa [#allocation4], 1 }

// kernel: tpu_custom_call.1
= control target key start
LH: loop header
LB: loop body
LE: loop exit
PB: predicated region body
PF: predicated region fallthrough
CT: control target
= control target key end

     0   :  { %10 = vsyncpa [#allocation3], 0  ;;  %s1349_s0 = inlined_call_operand.hbm [shape: f32[8,1024], index: 0, kind: input, shape index: {}]   ;;  %s1350_s1 = inlined_call_operand.hbm [shape: bf16[1024,128], index: 1, kind: input, shape index: {}]   ;;  %s1351_s2 = inlined_call_operand.vmem [shape: f32[1,128], index: 2, kind: input, shape index: {}]   ;;  %s1352_s3 = inlined_call_operand.hbm [shape: bf16[128,128], index: 3, kind: input, shape index: {}]   ;;  %s1353_s4 = inlined_call_operand.vmem [shape: f32[1,128], index: 4, kind: input, shape index: {}]   ;;  %s1354_s5 = inlined_call_operand.hbm [shape: f32[8,128], index: 5, kind: output, shape index: {}]  }
   0x1   :  { %11 = vsyncpa [#allocation6], 0 }
   0x2   :  { %12 = vsyncpa [#allocation4], 0  ;;  %s1251_s18 = smov [#allocation5]   ;;  %s1157_s22 = scalar_lea.hbm %s1350_s1, 8192 }
   0x3   :  { %s28_s19 = sshll.u32 %s1251_s18, 4  ;;  %p1158_p0 = scmp.ne.s32.totalorder %s1350_s1, %s1157_s22  ;;  %s29_s19 = int_to_ptr.vmem [resolvable:$true] %s28_s19 }
   0x4   :  { %p1161_p1 = scmp.lt.u32.totalorder %s1157_s22, %s1350_s1 }
   0x6   :  { %p1163_p2 = pnand %p1161_p1, %p1158_p0 }
   0x8   :  { %1166 = shalt.err (!%p1163_p2)
}
   0x9   :  { %s1167_s27 = scalar_lea.vmem %s29_s19, 8192  ;;  %p1172_p4 = scmp.lt.s32.totalorder %s29_s19, %s29_s19 }
   0xa   :  { %p1168_p3 = scmp.ne.s32.totalorder %s29_s19, %s1167_s27  ;;  %p1173_p5 = scmp.lt.s32.totalorder %s1167_s27, %s1167_s27 }
   0xc   :  { %p1174_p6 = por %p1173_p5, %p1172_p4 }
   0xe   :  { %p1175_p7 = pnand %p1174_p6, %p1168_p3 }
  0x10   :  { %1178 = shalt.err (!%p1175_p7)
}
  0x11   :  { %s1252_s28 = smov 64   ;;  %s1253_s29 = smov 4  }
  0x12   :  { %34 = dma.hbm_to_vmem [thread:$0]  %s1350_s1, 8192, %s29_s19, [#allocation6], %s1252_s28, %s1252_s28, %s1253_s29  }
  0x13   :  { %s1254_s7 = smov [#allocation2]   ;;  %s1255_s9 = smov [#allocation7]  }
  0x14   :  { %s19_s8 = sshll.u32 %s1254_s7, 4  ;;  %s42_s10 = sshll.u32 %s1255_s9, 4  ;;  %s20_s8 = int_to_ptr.vmem [resolvable:$true] %s19_s8  ;;  %s43_s10 = int_to_ptr.vmem [resolvable:$true] %s42_s10 }
  0x15   :  { %s1179_s13 = scalar_lea.hbm %s1349_s0, 1024 }
  0x16   :  { %p1180_p8 = scmp.ne.s32.totalorder %s1349_s0, %s1179_s13  ;;  %p1183_p9 = scmp.lt.u32.totalorder %s1179_s13, %s1349_s0 }
  0x18   :  { %p1185_p10 = pnand %p1183_p9, %p1180_p8 }
  0x1a   :  { %1188 = shalt.err (!%p1185_p10)
}
  0x1b   :  { %s1189_s1 = scalar_lea.vmem %s20_s8, 1024  ;;  %p1194_p12 = scmp.lt.s32.totalorder %s20_s8, %s20_s8 }
  0x1c   :  { %p1190_p11 = scmp.ne.s32.totalorder %s20_s8, %s1189_s1  ;;  %p1195_p13 = scmp.lt.s32.totalorder %s1189_s1, %s1189_s1 }
  0x1e   :  { %p1196_p0 = por %p1195_p13, %p1194_p12 }
  0x20   :  { %p1197_p1 = pnand %p1196_p0, %p1190_p11 }
  0x22   :  { %1200 = shalt.err (!%p1197_p1)
}
  0x23   :  { %22 = dma.hbm_to_vmem [thread:$0]  %s1349_s0, 1024, %s20_s8, [#allocation3]  }
  0x24   :  { %s1201_s22 = scalar_lea.hbm %s1352_s3, 1024 }
  0x25   :  { %p1202_p2 = scmp.ne.s32.totalorder %s1352_s3, %s1201_s22  ;;  %p1205_p3 = scmp.lt.u32.totalorder %s1201_s22, %s1352_s3 }
  0x27   :  { %p1207_p4 = pnand %p1205_p3, %p1202_p2 }
  0x29   :  { %1210 = shalt.err (!%p1207_p4)
}
  0x2a   :  { %s1211_s27 = scalar_lea.vmem %s43_s10, 1024  ;;  %p1216_p6 = scmp.lt.s32.totalorder %s43_s10, %s43_s10 }
  0x2b   :  { %p1212_p5 = scmp.ne.s32.totalorder %s43_s10, %s1211_s27  ;;  %p1217_p7 = scmp.lt.s32.totalorder %s1211_s27, %s1211_s27 }
  0x2d   :  { %p1218_p8 = por %p1217_p7, %p1216_p6 }
  0x2f   :  { %p1219_p9 = pnand %p1218_p8, %p1212_p5 }
  0x31   :  { %1222 = shalt.err (!%p1219_p9)
}
  0x32   :  { %48 = dma.hbm_to_vmem [thread:$0]  %s1352_s3, 1024, %s43_s10, [#allocation6], %s1252_s28, %s1252_s28, %s1253_s29  }
  0x33   :  { %1245 = dma.done.wait [#allocation3], 1024  }
  0x34   :  { %1246 = vsyncadd [#allocation3], 4294966272 }
  0x35   :  { %1247 = dma.done.wait [#allocation6], 9216  }
  0x36   :  { %1248 = vsyncadd [#allocation6], 4294958080  ;;  %v1085_v0 = vld [vmem:[#allocation5 + $0x40] sm:$0xff]   ;;  %v1089_v4 = vld [vmem:[#allocation5 + $0x48] sm:$0xff]   ;;  %vm1257_vm0 = vmmov 0   ;;  %s1258_s6 = smov [#allocation8]  }
  0x37   :  { %v1086_v1 = vld [vmem:[#allocation5 + $0xc0] sm:$0xff]   ;;  %960 = vmatprep.subr.bf16.mxu0 %v1085_v0  ;;  %v1090_v5 = vld [vmem:[#allocation5 + $0xc8] sm:$0xff]   ;;  %v1093_v8 = vld [vmem:[#allocation5 + $0x50] sm:$0xff]   ;;  %s876_s7 = sshll.u32 %s1258_s6, 4  ;;  %s877_s7 = int_to_ptr.vmem [resolvable:$true] %s876_s7 }
  0x38   :  { %v1087_v2 = vld [vmem:[#allocation5] sm:$0xff]   ;;  %982 = vmatprep.subr.bf16.mxu1 %v1086_v1  ;;  %v1091_v6 = vld [vmem:[#allocation5 + $0x8] sm:$0xff]   ;;  %v1094_v9 = vld [vmem:[#allocation5 + $0xd0] sm:$0xff]   ;;  %s1223_s8 = scalar_lea.vmem %s877_s7, 128  ;;  %p1228_p11 = scmp.lt.s32.totalorder %s877_s7, %s877_s7 }
  0x39   :  { %v1088_v3 = vld [vmem:[#allocation5 + $0x80] sm:$0xff]   ;;  %961 = vmatpush3.bf16.msra.mxu0 %v1087_v2  ;;  %v1092_v7 = vld [vmem:[#allocation5 + $0x88] sm:$0xff]   ;;  %v1095_v10 = vld [vmem:[#allocation5 + $0x10] sm:$0xff]   ;;  %p1224_p10 = scmp.ne.s32.totalorder %s877_s7, %s1223_s8  ;;  %p1229_p12 = scmp.lt.s32.totalorder %s1223_s8, %s1223_s8 }
  0x3a   :  { %983 = vmatpush3.bf16.msra.mxu1 %v1088_v3  ;;  %962 = vmatprep.subr.bf16.mxu0 %v1089_v4  ;;  %v1096_v11 = vld [vmem:[#allocation5 + $0x90] sm:$0xff]   ;;  %v1097_v12 = vld [vmem:[#allocation5 + $0x58] sm:$0xff]   ;;  %v1101_v16 = vld [vmem:[#allocation5 + $0x60] sm:$0xff]  }
  0x3b   :  { %984 = vmatprep.subr.bf16.mxu1 %v1090_v5  ;;  %v1098_v13 = vld [vmem:[#allocation5 + $0xd8] sm:$0xff]   ;;  %v1102_v17 = vld [vmem:[#allocation5 + $0xe0] sm:$0xff]   ;;  %v1105_v20 = vld [vmem:[#allocation5 + $0x68] sm:$0xff]   ;;  %p1230_p13 = por %p1229_p12, %p1228_p11 }
  0x3c   :  { %v1099_v14 = vld [vmem:[#allocation5 + $0x18] sm:$0xff]   ;;  %v1103_v18 = vld [vmem:[#allocation5 + $0x20] sm:$0xff]   ;;  %v1106_v21 = vld [vmem:[#allocation5 + $0xe8] sm:$0xff]  }
  0x3d   :  { %963 = vmatpush3.bf16.msra.mxu0 %v1091_v6  ;;  %v1100_v15 = vld [vmem:[#allocation5 + $0x98] sm:$0xff]   ;;  %v1104_v19 = vld [vmem:[#allocation5 + $0xa0] sm:$0xff]   ;;  %v1107_v22 = vld [vmem:[#allocation5 + $0x28] sm:$0xff]   ;;  %p1231_p0 = pnand %p1230_p13, %p1224_p10 }
  0x3e   :  { %985 = vmatpush3.bf16.msra.mxu1 %v1092_v7  ;;  %964 = vmatprep.subr.bf16.mxu0 %v1093_v8  ;;  %v1108_v23 = vld [vmem:[#allocation5 + $0xa8] sm:$0xff]   ;;  %v1109_v24 = vld [vmem:[#allocation5 + $0x70] sm:$0xff]   ;;  %v1113_v28 = vld [vmem:[#allocation5 + $0x78] sm:$0xff]  }
  0x3f   :  { %986 = vmatprep.subr.bf16.mxu1 %v1094_v9  ;;  %v1110_v25 = vld [vmem:[#allocation5 + $0xf0] sm:$0xff]   ;;  %v1114_v29 = vld [vmem:[#allocation5 + $0xf8] sm:$0xff]   ;;  %v62_v32 = vld [vmem:[#allocation2 + $0x8] sm:$0xff] }
  0x40   :  { %v1111_v26 = vld [vmem:[#allocation5 + $0x30] sm:$0xff]   ;;  %v1115_v30 = vld [vmem:[#allocation5 + $0x38] sm:$0xff]   ;;  %v61_v34 = vld [vmem:[#allocation2] sm:$0xff]  ;;  %v70_v35 = vpack.c.bf16 %v62_v32, %v62_v32 }
  0x41   :  { %965 = vmatpush3.bf16.msra.mxu0 %v1095_v10  ;;  %v1112_v27 = vld [vmem:[#allocation5 + $0xb0] sm:$0xff]   ;;  %v1116_v31 = vld [vmem:[#allocation5 + $0xb8] sm:$0xff]   ;;  %v69_v37 = vpack.c.bf16 %v61_v34, %v61_v34  ;;  %v1117_v40 = vld [vmem:[#allocation5 + $0x140] sm:$0xff]  }
  0x42   :  { %987 = vmatpush3.bf16.msra.mxu1 %v1096_v11  ;;  %966 = vmatprep.subr.bf16.mxu0 %v1097_v12  ;;  %v64_v33 = vld [vmem:[#allocation2 + $0x18] sm:$0xff]  ;;  %v63_v38 = vld [vmem:[#allocation2 + $0x10] sm:$0xff]  ;;  %v1118_v41 = vld [vmem:[#allocation5 + $0x1c0] sm:$0xff]  }
  0x43   :  { %988 = vmatprep.subr.bf16.mxu1 %v1098_v13  ;;  %v72_v36 = vpack.c.bf16 %v64_v33, %v64_v33  ;;  %v71_v39 = vpack.c.bf16 %v63_v38, %v63_v38  ;;  %628 = vmatprep.mubr.bf16.mxu0 %v70_v35  ;;  %v1119_v42 = vld [vmem:[#allocation5 + $0x100] sm:$0xff]   ;;  %v1121_v44 = vld [vmem:[#allocation5 + $0x148] sm:$0xff]   ;;  %v1125_v48 = vld [vmem:[#allocation5 + $0x150] sm:$0xff]  }
  0x44   :  { %v1120_v43 = vld [vmem:[#allocation5 + $0x180] sm:$0xff]   ;;  %v1122_v45 = vld [vmem:[#allocation5 + $0x1c8] sm:$0xff]   ;;  %v1126_v49 = vld [vmem:[#allocation5 + $0x1d0] sm:$0xff]  }
  0x45   :  { %967 = vmatpush3.bf16.msra.mxu0 %v1099_v14  ;;  %668 = vmatprep.mubr.bf16.mxu1 %v72_v36  ;;  %v1123_v46 = vld [vmem:[#allocation5 + $0x108] sm:$0xff]   ;;  %v1127_v50 = vld [vmem:[#allocation5 + $0x110] sm:$0xff]   ;;  %v1129_v52 = vld [vmem:[#allocation5 + $0x158] sm:$0xff]  }
  0x46   :  { %989 = vmatpush3.bf16.msra.mxu1 %v1100_v15  ;;  %968 = vmatprep.subr.bf16.mxu0 %v1101_v16  ;;  %v1124_v47 = vld [vmem:[#allocation5 + $0x188] sm:$0xff]   ;;  %v1128_v51 = vld [vmem:[#allocation5 + $0x190] sm:$0xff]   ;;  %v1130_v53 = vld [vmem:[#allocation5 + $0x1d8] sm:$0xff]  }
  0x47   :  { %990 = vmatprep.subr.bf16.mxu1 %v1102_v17  ;;  %v1131_v54 = vld [vmem:[#allocation5 + $0x118] sm:$0xff]   ;;  %v1133_v56 = vld [vmem:[#allocation5 + $0x160] sm:$0xff]   ;;  %v1137_v60 = vld [vmem:[#allocation5 + $0x168] sm:$0xff]   ;;  %v1256_v17 = vmov 0.0  }
  0x48   :  { %v1132_v55 = vld [vmem:[#allocation5 + $0x198] sm:$0xff]   ;;  %v1134_v57 = vld [vmem:[#allocation5 + $0x1e0] sm:$0xff]   ;;  %v1138_v61 = vld [vmem:[#allocation5 + $0x1e8] sm:$0xff]  }
  0x49   :  { %969 = vmatpush3.bf16.msra.mxu0 %v1103_v18  ;;  %v1135_v58 = vld [vmem:[#allocation5 + $0x120] sm:$0xff]   ;;  %v1139_v62 = vld [vmem:[#allocation5 + $0x128] sm:$0xff]   ;;  %v1141_v0 = vld [vmem:[#allocation5 + $0x170] sm:$0xff]  }
  0x4a   :  { %991 = vmatpush3.bf16.msra.mxu1 %v1104_v19  ;;  %970 = vmatprep.subr.bf16.mxu0 %v1105_v20  ;;  %v1136_v59 = vld [vmem:[#allocation5 + $0x1a0] sm:$0xff]   ;;  %v1140_v63 = vld [vmem:[#allocation5 + $0x1a8] sm:$0xff]   ;;  %v1142_v1 = vld [vmem:[#allocation5 + $0x1f0] sm:$0xff]  }
  0x4b   :  { %992 = vmatprep.subr.bf16.mxu1 %v1106_v21  ;;  %v1143_v2 = vld [vmem:[#allocation5 + $0x130] sm:$0xff]   ;;  %v1145_v4 = vld [vmem:[#allocation5 + $0x178] sm:$0xff]   ;;  %v66_v8 = vld [vmem:[#allocation2 + $0x28] sm:$0xff] }
  0x4c   :  { %v1144_v3 = vld [vmem:[#allocation5 + $0x1b0] sm:$0xff]   ;;  %v1146_v5 = vld [vmem:[#allocation5 + $0x1f8] sm:$0xff]   ;;  %v74_v10 = vpack.c.bf16 %v66_v8, %v66_v8  ;;  %v65_v12 = vld [vmem:[#allocation2 + $0x20] sm:$0xff] }
  0x4d   :  { %971 = vmatpush3.bf16.msra.mxu0 %v1107_v22  ;;  %v1147_v6 = vld [vmem:[#allocation5 + $0x138] sm:$0xff]   ;;  %v67_v13 = vld [vmem:[#allocation2 + $0x30] sm:$0xff]  ;;  %v73_v14 = vpack.c.bf16 %v65_v12, %v65_v12  ;;  %v1149_v16 = vld [vmem:[#allocation7] sm:$0xff]  }
  0x4e   :  { %993 = vmatpush3.bf16.msra.mxu1 %v1108_v23  ;;  %972 = vmatprep.subr.bf16.mxu0 %v1109_v24  ;;  %v1148_v7 = vld [vmem:[#allocation5 + $0x1b8] sm:$0xff]   ;;  %v75_v15 = vpack.c.bf16 %v67_v13, %v67_v13  ;;  %v1150_v18 = vld [vmem:[#allocation7 + $0x8] sm:$0xff]   ;;  %v1151_v19 = vld [vmem:[#allocation7 + $0x10] sm:$0xff]  }
  0x4f   :  { %994 = vmatprep.subr.bf16.mxu1 %v1110_v25  ;;  %v68_v9 = vld [vmem:[#allocation2 + $0x38] sm:$0xff]  ;;  %v1153_v21 = vld [vmem:[#allocation7 + $0x20] sm:$0xff]   ;;  %v1154_v22 = vld [vmem:[#allocation7 + $0x28] sm:$0xff]  }
  0x50   :  { %v76_v11 = vpack.c.bf16 %v68_v9, %v68_v9  ;;  %v1152_v20 = vld [vmem:[#allocation7 + $0x18] sm:$0xff]   ;;  %v1155_v23 = vld [vmem:[#allocation7 + $0x30] sm:$0xff]  }
  0x51   :  { %973 = vmatpush3.bf16.msra.mxu0 %v1111_v26  ;;  %v1156_v24 = vld [vmem:[#allocation7 + $0x38] sm:$0xff]  }
  0x52   :  { %995 = vmatpush3.bf16.msra.mxu1 %v1112_v27  ;;  %974 = vmatprep.subr.bf16.mxu0 %v1113_v28  ;;  %v886_v27 = vld [vmem:[%s1351_s2] ss:$0 sm:$0xff] }
  0x53   :  { %996 = vmatprep.subr.bf16.mxu1 %v1114_v29 }
  0x55   :  { %975 = vmatpush3.bf16.msra.mxu0 %v1115_v30 }
  0x56   :  { %997 = vmatpush3.bf16.msra.mxu1 %v1116_v31  ;;  %1004 = vmatprep.subr.bf16.mxu0 %v1117_v40 }
  0x57   :  { %1026 = vmatprep.subr.bf16.mxu1 %v1118_v41 }
  0x58   :  { %629 = vmatmul.mubr.bf16.vlgmr.msra.gmra.mrb[0].mxu0 %v69_v37 }
  0x59   :  { %669 = vmatmul.mubr.bf16.vlgmr.msra.gmra.mrb[0].mxu1 %v71_v39  ;;  %1005 = vmatpush3.bf16.msra.mxu0 %v1119_v42 }
  0x5a   :  { %1027 = vmatpush3.bf16.msra.mxu1 %v1120_v43  ;;  %1006 = vmatprep.subr.bf16.mxu0 %v1121_v44 }
  0x5b   :  { %1028 = vmatprep.subr.bf16.mxu1 %v1122_v45  ;;  %708 = vmatprep.mubr.bf16.mxu0 %v74_v10 }
  0x5c   :  { %748 = vmatprep.mubr.bf16.mxu1 %v76_v11 }
  0x5d   :  { %1007 = vmatpush3.bf16.msra.mxu0 %v1123_v46 }
  0x5e   :  { %1029 = vmatpush3.bf16.msra.mxu1 %v1124_v47  ;;  %1008 = vmatprep.subr.bf16.mxu0 %v1125_v48 }
  0x5f   :  { %1030 = vmatprep.subr.bf16.mxu1 %v1126_v49 }
  0x61   :  { %1009 = vmatpush3.bf16.msra.mxu0 %v1127_v50 }
  0x62   :  { %1031 = vmatpush3.bf16.msra.mxu1 %v1128_v51  ;;  %1010 = vmatprep.subr.bf16.mxu0 %v1129_v52  ;;  %v951_v52 = vld [vmem:[%s1353_s4] ss:$0 sm:$0xff] }
  0x63   :  { %1032 = vmatprep.subr.bf16.mxu1 %v1130_v53 }
  0x65   :  { %1011 = vmatpush3.bf16.msra.mxu0 %v1131_v54 }
  0x66   :  { %1033 = vmatpush3.bf16.msra.mxu1 %v1132_v55  ;;  %1012 = vmatprep.subr.bf16.mxu0 %v1133_v56 }
  0x67   :  { %1034 = vmatprep.subr.bf16.mxu1 %v1134_v57 }
  0x69   :  { %1013 = vmatpush3.bf16.msra.mxu0 %v1135_v58 }
  0x6a   :  { %1035 = vmatpush3.bf16.msra.mxu1 %v1136_v59  ;;  %1014 = vmatprep.subr.bf16.mxu0 %v1137_v60 }
  0x6b   :  { %1036 = vmatprep.subr.bf16.mxu1 %v1138_v61 }
  0x6d   :  { %1015 = vmatpush3.bf16.msra.mxu0 %v1139_v62 }
  0x6e   :  { %1037 = vmatpush3.bf16.msra.mxu1 %v1140_v63  ;;  %1016 = vmatprep.subr.bf16.mxu0 %v1141_v0 }
  0x6f   :  { %1038 = vmatprep.subr.bf16.mxu1 %v1142_v1 }
  0x71   :  { %1017 = vmatpush3.bf16.msra.mxu0 %v1143_v2 }
  0x72   :  { %1039 = vmatpush3.bf16.msra.mxu1 %v1144_v3  ;;  %1018 = vmatprep.subr.bf16.mxu0 %v1145_v4 }
  0x73   :  { %1040 = vmatprep.subr.bf16.mxu1 %v1146_v5 }
  0x75   :  { %1019 = vmatpush3.bf16.msra.mxu0 %v1147_v6 }
  0x76   :  { %1041 = vmatpush3.bf16.msra.mxu1 %v1148_v7  ;;  %1057 = vmatprep.subr.bf16.mxu0 %v1256_v17 }
  0x78   :  { %709 = vmatmul.mubr.bf16.vlgmr.msra.gmra.mrb[4].mxu0 %v73_v14 }
  0x79   :  { %749 = vmatmul.mubr.bf16.vlgmr.msra.gmra.mrb[4].mxu1 %v75_v15  ;;  %1058 = vmatpush3.bf16.msra.mxu0 %v1149_v16 }
  0x7a   :  { %1059 = vmatprep.subr.bf16.mxu0 %v1256_v17  ;;  %1073 = vmatprep.mubr.msk.bf16.mxu0 %vm1257_vm0, %v1256_v17 }
  0x7d   :  { %1060 = vmatpush3.bf16.msra.mxu0 %v1150_v18 }
  0x7e   :  { %1061 = vmatprep.subr.bf16.mxu0 %v1256_v17 }
  0x81   :  { %1062 = vmatpush3.bf16.msra.mxu0 %v1151_v19 }
  0x82   :  { %1063 = vmatprep.subr.bf16.mxu0 %v1256_v17 }
  0x85   :  { %1064 = vmatpush3.bf16.msra.mxu0 %v1152_v20 }
  0x86   :  { %1065 = vmatprep.subr.bf16.mxu0 %v1256_v17 }
  0x89   :  { %1066 = vmatpush3.bf16.msra.mxu0 %v1153_v21 }
  0x8a   :  { %1067 = vmatprep.subr.bf16.mxu0 %v1256_v17 }
  0x8d   :  { %1068 = vmatpush3.bf16.msra.mxu0 %v1154_v22 }
  0x8e   :  { %1069 = vmatprep.subr.bf16.mxu0 %v1256_v17 }
  0x91   :  { %1070 = vmatpush3.bf16.msra.mxu0 %v1155_v23 }
  0x92   :  { %1071 = vmatprep.subr.bf16.mxu0 %v1256_v17 }
  0x95   :  { %1072 = vmatpush3.bf16.msra.mxu0 %v1156_v24 }
 0x12b   :  { %v976_v25 = vpop.f32.mrb[0].mxu0 }
 0x12c   :  { %v998_v26 = vpop.f32.mrb[0].mxu1  ;;  %v977_v28 = vpop.f32.mrb[1].mxu0 }
 0x12d   :  { %v999_v29 = vpop.f32.mrb[1].mxu1  ;;  %v978_v30 = vadd.f32 %v977_v28, %v976_v25  ;;  %v979_v32 = vpop.f32.mrb[2].mxu0 }
 0x12e   :  { %v1000_v31 = vadd.f32 %v999_v29, %v998_v26  ;;  %v1001_v33 = vpop.f32.mrb[2].mxu1  ;;  %v980_v34 = vpop.f32.mrb[3].mxu0 }
 0x12f   :  { %v1002_v35 = vpop.f32.mrb[3].mxu1  ;;  %v631_v36 = vadd.f32 %v978_v30, %v886_v27 }
 0x131   :  { %v671_v37 = vadd.f32 %v1000_v31, %v631_v36 }
 0x14b   :  { %v1020_v38 = vpop.f32.mrb[4].mxu0 }
 0x14c   :  { %v1042_v39 = vpop.f32.mrb[4].mxu1  ;;  %v1021_v40 = vpop.f32.mrb[5].mxu0 }
 0x14d   :  { %v1022_v41 = vadd.f32 %v1021_v40, %v1020_v38  ;;  %v1043_v42 = vpop.f32.mrb[5].mxu1  ;;  %v1023_v43 = vpop.f32.mrb[6].mxu0 }
 0x14e   :  { %v1044_v44 = vadd.f32 %v1043_v42, %v1042_v39  ;;  %v1045_v45 = vpop.f32.mrb[6].mxu1  ;;  %v1024_v46 = vpop.f32.mrb[7].mxu0 }
 0x14f   :  { %v711_v47 = vadd.f32 %v1022_v41, %v671_v37  ;;  %v1046_v48 = vpop.f32.mrb[7].mxu1 }
 0x151   :  { %v751_v49 = vadd.f32 %v1044_v44, %v711_v47 }
 0x153   :  { %v756_v50 = vmax.f32 %v751_v49, 0.0 }
 0x155   :  { %v757_v51 = vpack.c.bf16 %v756_v50, %v756_v50 }
 0x157   :  { %1074 = vmatmul.mubr.bf16.vlgmr.msra.gmra.mrb[8].mxu0 %v757_v51 }
 0x22a   :  { %v863_v53 = vpop.f32.mrb[8].mxu0 }
 0x22b   :  { %v864_v54 = vadd.f32 %v951_v52, %v863_v53  ;;  %v1075_v55 = vpop.f32.mrb[9].mxu0 }
 0x22c   :  { %v866_v56 = vpop.f32.mrb[10].mxu0 }
 0x22d   :  { %869 = vst [vmem:[#allocation8] sm:$0xff] %v864_v54  ;;  %v1076_v57 = vpop.f32.mrb[11].mxu0 }
 0x22e   :  { %1234 = shalt.err (!%p1231_p0)
}
 0x22f   :  { %s1235_s4 = scalar_lea.hbm %s1354_s5, 128 }
 0x230   :  { %p1236_p1 = scmp.ne.s32.totalorder %s1354_s5, %s1235_s4  ;;  %p1239_p2 = scmp.lt.u32.totalorder %s1235_s4, %s1354_s5 }
 0x232   :  { %p1241_p3 = pnand %p1239_p2, %p1236_p1 }
 0x234   :  { %1244 = shalt.err (!%p1241_p3)
}
 0x235   :  { %879 = dma.vmem_to_hbm [thread:$0]  %s877_s7, 128, %s1354_s5, [#allocation4]  }
 0x236   :  { %1249 = dma.done.wait [#allocation4], 128  }
 0x237   :  { %1250 = vsyncadd [#allocation4], 4294967168 }
 0x238   :  { %883 = vsyncpa [#allocation3], 1 }
 0x239   :  { %884 = vsyncpa [#allocation6], 1 }
 0x23a   :  { %885 = vsyncpa [#allocation4], 1 }

</bundles_post_ra>
